<compile_context>
chip_gen: v7x
topology: tpu7x:2x2x1
jax: 0.10.0
libtpu: 0.0.40
codegen_flags: <defaults>
</compile_context>

<pallas_src>
import jax
import jax.numpy as jnp
from jax.experimental import pallas as pl
from jax.experimental.pallas import tpu as pltpu


def cross_attention_kernel(x_ref, bias_ref, wkv_ref, bkv_ref, mq_ref, mt_ref,
                           ctx_ref):
    """One grid step processes Bt batch elements.

    x_ref    : (Bt, S, H)  bf16  hidden states
    bias_ref : (Bt, S, nh) f32   additive key-padding bias (0 valid / -1e30 pad)
    wkv_ref  : (H, 2H)     bf16  fused, pre-transposed K/V projection weights
    bkv_ref  : (1, 2H)     f32   fused K/V bias
    mq_ref   : (H, nh)     bf16  query+scale fold:      scores   = k @ Mq
    mt_ref   : (nh, H)     bf16  head->channel expand:  attn_full = attn @ MT
    ctx_ref  : (Bt, H)     f32   un-projected attention context (output)
    """
    Bt, S, H = x_ref.shape
    nh = mq_ref.shape[1]

    x = x_ref[...].reshape(Bt * S, H)                                       # bf16

    # Fused K/V projection: one bf16 x bf16 [Bt*S, H] @ [H, 2H] matmul, f32 acc.
    kv = jnp.dot(x, wkv_ref[...], preferred_element_type=jnp.float32) + bkv_ref[...]
    # (H is a multiple of 128 in the demo, so these lane slices are vreg-aligned.)
    k = kv[:, :H].astype(jnp.bfloat16)                                      # scores operand
    v = kv[:, H:]                                                           # context operand (f32)

    # Per-head scaled scores; query and 1/sqrt(head_dim) are folded into Mq:
    #   scores[s, h] = sum_j k[s, j] * q[j] * scale * [head(j) == h]
    scores = jnp.dot(k, mq_ref[...], preferred_element_type=jnp.float32)    # [Bt*S, nh]
    scores = scores.reshape(Bt, S, nh) + bias_ref[...]                      # key-padding bias

    # Softmax over the key axis (S), per (batch, head), in f32.
    # TODO(synk): for large production S, transpose scores to (Bt, nh, S) so the
    # reduction axis sits on lanes (full-width VPU/EUP); negligible at S=8.
    m = jnp.max(scores, axis=1, keepdims=True)                              # [Bt, 1, nh]
    p = jnp.exp(scores - m)
    denom = jnp.sum(p, axis=1, keepdims=True)
    attn = p * pl.reciprocal(denom, approx=True)                            # [Bt, S, nh]

    # Expand per-head weights across that head's channels (bf16 MXU, f32 acc),
    # weight V, reduce over S in f32.
    attn_full = jnp.dot(attn.reshape(Bt * S, nh).astype(jnp.bfloat16), mt_ref[...],
                        preferred_element_type=jnp.float32)                 # [Bt*S, H]
    ctx_ref[...] = jnp.sum((attn_full * v).reshape(Bt, S, H), axis=1)       # [Bt, H] f32


def _tensorcores_per_chip():
    """Best-effort TensorCore-per-chip count (v7x / megacore -> 2, else 1)."""
    try:
        kind = jax.devices()[0].device_kind.lower()
    except Exception:
        return 1
    if "v7" in kind:
        return 2
    if ("v4" in kind) or ("v5p" in kind) or ("v5 p" in kind):
        return 2
    return 1


def _choose_block_b(B, S, H, nh, num_cores):
    """Generation-aware batch-block size (must divide B)."""
    # Rows fed to the dominant [Bt*S, H] @ [H, 2H] matmul per grid step.
    target_rows = 1024 if num_cores == 1 else 256
    # Rough per-row VMEM footprint of the pipelined per-step blocks + temps
    # (x bf16, bias f32, kv f32, attn_full/v f32) — stay well under 64 MiB/TC.
    per_row_bytes = H * 2 + nh * 4 + 2 * H * 4 + 2 * H * 4
    budget = 24 << 20

    divisors = [d for d in range(1, B + 1) if B % d == 0]
    if num_cores > 1:
        cands = [d for d in divisors if B // d >= num_cores] or divisors
    else:
        cands = divisors
    cands = [d for d in cands if 2 * d * S * per_row_bytes <= budget] or [min(cands)]
    for d in sorted(cands):               # round Bt*S *up* to the row target
        if d * S >= target_rows:
            return d
    return max(cands)                     # nothing reaches the target: biggest that fits


def cross_attention_pallas(hidden_states, attention_mask, params, num_heads,
                           block_b=None):
    B, S, H = hidden_states.shape
    assert H % num_heads == 0
    assert S % 8 == 0, "seq_len must be a multiple of 8 (f32 sublane) for in-kernel reshapes"
    head_dim = H // num_heads
    scale = 1.0 / (head_dim ** 0.5)
    f32, bf16 = jnp.float32, jnp.bfloat16

    # ---- hoisted, batch-invariant precomputation (runs once, outside the kernel) ----
    # Query projection folded (with the softmax scale) into the head-sum matrix.
    q = params["query"].reshape(1, H) @ params["wq"].T + params["bq"].reshape(1, H)   # [1, H]
    head_ids = jnp.arange(H) // head_dim
    M = (head_ids[:, None] == jnp.arange(num_heads)[None, :]).astype(f32)   # [H, nh]
    Mq = (M * (q.reshape(H, 1) * scale)).astype(bf16)                       # scores = k @ Mq
    MT = M.T.astype(bf16)                                                   # [nh, H]

    # Fused + pre-transposed K/V projection weights (bf16 for MXU throughput).
    wkvT = jnp.concatenate([params["wk"].T, params["wv"].T], axis=1).astype(bf16)     # [H, 2H]
    bkv = jnp.concatenate([params["bk"], params["bv"]]).reshape(1, 2 * H).astype(f32)
    woT = params["wo"].T.astype(bf16)                                       # [H, H] (used in XLA)
    bo = params["bo"].reshape(1, H).astype(f32)

    # Additive key-padding bias, broadcast to the (B, S, nh) scores layout so the
    # in-kernel add is a plain full-block VPU op with a contiguous DMA.
    pad = (attention_mask.astype(f32) - 1.0) * 1e30                          # [B, S]
    neg_bias = jnp.broadcast_to(pad[:, :, None], (B, S, num_heads)).astype(f32)

    x = hidden_states.astype(bf16)

    # ---- generation-aware batch blocking ----
    num_cores = _tensorcores_per_chip()
    if block_b is None:
        block_b = _choose_block_b(B, S, H, num_heads, num_cores)
    assert B % block_b == 0
    grid = (B // block_b,)

    # VMEM limit sized to actual residency (weights + double-buffered blocks + temps).
    itemsize = lambda a: a.size * a.dtype.itemsize
    weight_bytes = itemsize(wkvT) + itemsize(bkv) + itemsize(Mq) + itemsize(MT)
    block_bytes = block_b * S * H * 2 + block_b * S * num_heads * 4 + block_b * H * 4
    temps_bytes = 8 * block_b * S * H * 4
    vmem_limit = int(min(max(2 * (2 * weight_bytes + 2 * block_bytes + temps_bytes),
                             32 << 20), 64 << 20))

    def run(single_buffer_weights):
        if single_buffer_weights:
            # Constants never change across the grid -> single-buffer them.
            const = lambda a: pl.BlockSpec(a.shape, lambda b: (0,) * a.ndim,
                                           pipeline_mode=pl.Buffered(1))
        else:
            const = lambda a: pl.BlockSpec(a.shape, lambda b: (0,) * a.ndim)
        return pl.pallas_call(
            cross_attention_kernel,
            out_shape=jax.ShapeDtypeStruct((B, H), f32),
            grid=grid,
            in_specs=[
                pl.BlockSpec((block_b, S, H), lambda b: (b, 0, 0)),          # hidden_states (bf16)
                pl.BlockSpec((block_b, S, num_heads), lambda b: (b, 0, 0)),  # key-padding bias
                const(wkvT), const(bkv), const(Mq), const(MT),
            ],
            out_specs=pl.BlockSpec((block_b, H), lambda b: (b, 0)),
            compiler_params=pltpu.CompilerParams(
                dimension_semantics=("parallel",),
                vmem_limit_bytes=vmem_limit),
        )(x, neg_bias, wkvT, bkv, Mq, MT)

    try:
        ctx = jax.block_until_ready(run(single_buffer_weights=True))
    except Exception:
        # Buffered(1) not supported on this jax/libtpu combo: fall back to the
        # default double-buffered constants (identical results, a bit more VMEM).
        ctx = jax.block_until_ready(run(single_buffer_weights=False))

    # Output projection hoisted to XLA: one [B, H] @ [H, H] matmul (near-free,
    # and Wo/bo stay out of kernel VMEM residency).
    out = jnp.dot(ctx.astype(bf16), woT, preferred_element_type=f32) + bo    # [B, H]
    return out.reshape(B, 1, H)


def cross_attention_reference(hidden_states, attention_mask, params, num_heads):
    """Plain-JAX replica of torch.nn.MultiheadAttention forward with a learnable query."""
    B, S, H = hidden_states.shape
    hd = H // num_heads
    query = jnp.broadcast_to(params["query"].reshape(1, 1, H), (B, 1, H))

    q = query @ params["wq"].T + params["bq"]
    k = hidden_states @ params["wk"].T + params["bk"]
    v = hidden_states @ params["wv"].T + params["bv"]

    q = q.reshape(B, 1, num_heads, hd).transpose(0, 2, 1, 3)   # [B, nh, 1, hd]
    k = k.reshape(B, S, num_heads, hd).transpose(0, 2, 1, 3)   # [B, nh, S, hd]
    v = v.reshape(B, S, num_heads, hd).transpose(0, 2, 1, 3)   # [B, nh, S, hd]

    scores = jnp.einsum("bhqd,bhkd->bhqk", q, k) / (hd ** 0.5)  # [B, nh, 1, S]
    pad = (attention_mask.astype(jnp.float32) - 1.0) * 1e30     # [B, S]
    scores = scores + pad[:, None, None, :]
    attn = jax.nn.softmax(scores, axis=-1)
    ctx = jnp.einsum("bhqk,bhkd->bhqd", attn, v)                # [B, nh, 1, hd]
    ctx = ctx.transpose(0, 2, 1, 3).reshape(B, 1, H)
    return ctx @ params["wo"].T + params["bo"]


def init_params(key, hidden_dim):
    ks = jax.random.split(key, 6)
    H = hidden_dim
    scale = 0.1
    return {
        "wq": jax.random.normal(ks[0], (H, H), jnp.float32) * scale,
        "wk": jax.random.normal(ks[1], (H, H), jnp.float32) * scale,
        "wv": jax.random.normal(ks[2], (H, H), jnp.float32) * scale,
        "wo": jax.random.normal(ks[3], (H, H), jnp.float32) * scale,
        "bq": jnp.zeros((H,), jnp.float32),
        "bk": jnp.zeros((H,), jnp.float32),
        "bv": jnp.zeros((H,), jnp.float32),
        "bo": jax.random.normal(ks[4], (H,), jnp.float32) * scale,
        "query": jax.random.normal(ks[5], (1, 1, H), jnp.float32),  # torch.randn(1,1,H)
    }


if __name__ == "__main__":
    B, S, H, NH = 2, 8, 128, 8
    key = jax.random.PRNGKey(0)
    k_x, k_p = jax.random.split(key)

    hidden_states = jax.random.normal(k_x, (B, S, H), jnp.float32)
    # attention_mask: 1 = valid, 0 = padded (second sequence has 3 padded tokens)
    attention_mask = jnp.array(
        [[1, 1, 1, 1, 1, 1, 1, 1],
         [1, 1, 1, 1, 1, 0, 0, 0]], dtype=jnp.int32)

    params = init_params(k_p, H)

    out = cross_attention_pallas(hidden_states, attention_mask, params, NH)
    out = jax.block_until_ready(out)
    assert out.shape == (B, 1, H)

    # Check 1: against a reference fed the same bf16-rounded operands
    # (isolates kernel-math errors from the intentional bf16 casts; the kernel
    # additionally rounds k/Mq/attn to bf16 for native MXU passes, hence the
    # slightly looser tolerance than a pure-f32-scores implementation).
    rd = lambda a: a.astype(jnp.bfloat16).astype(jnp.float32)
    params_rd = dict(params)
    for name in ("wk", "wv", "wo"):
        params_rd[name] = rd(params[name])
    ref_bf16 = cross_attention_reference(rd(hidden_states), attention_mask, params_rd, NH)
    assert jnp.allclose(out, ref_bf16, atol=4e-2, rtol=4e-2), "mismatch vs bf16-rounded reference"

    # Check 2: against the pure-f32 reference (loose tolerance: projections and
    # the small score/expansion matmuls run with bf16 operands by design).
    ref_f32 = cross_attention_reference(hidden_states, attention_mask, params, NH)
    assert jnp.allclose(out, ref_f32, atol=1e-1, rtol=1e-1), "mismatch vs f32 reference"

    print("KERNEL_OK")
</pallas_src>

<mosaic_0001>
module attributes {stable_mosaic.version = 11 : i64} {
  func.func @cross_attention_kernel(%arg0: i32, %arg1: memref<2x8x128xbf16, #tpu.memory_space<vmem>>, %arg2: memref<2x8x8xf32, #tpu.memory_space<vmem>>, %arg3: memref<128x256xbf16, #tpu.memory_space<vmem>>, %arg4: memref<1x256xf32, #tpu.memory_space<vmem>>, %arg5: memref<128x8xbf16, #tpu.memory_space<vmem>>, %arg6: memref<8x128xbf16, #tpu.memory_space<vmem>>, %arg7: memref<2x128xf32, #tpu.memory_space<vmem>>) attributes {dimension_semantics = [#tpu.dimension_semantics<parallel>], iteration_bounds = array<i64: 1>, scalar_prefetch = 0 : i64, scratch_operands = 0 : i64, tpu.core_type = #tpu.core_type<tc>, window_params = [{transform_indices = @transform_0, window_bounds = array<i64: 2, 8, 128>}, {transform_indices = @transform_1, window_bounds = array<i64: 2, 8, 8>}, {pipeline_mode = #tpu.pipeline_mode<synchronous>, transform_indices = @transform_2, window_bounds = array<i64: 128, 256>}, {pipeline_mode = #tpu.pipeline_mode<synchronous>, transform_indices = @transform_3, window_bounds = array<i64: 1, 256>}, {pipeline_mode = #tpu.pipeline_mode<synchronous>, transform_indices = @transform_4, window_bounds = array<i64: 128, 8>}, {pipeline_mode = #tpu.pipeline_mode<synchronous>, transform_indices = @transform_5, window_bounds = array<i64: 8, 128>}, {transform_indices = @transform_6, window_bounds = array<i64: 2, 128>}]} {
    %c0 = arith.constant 0 : index
    %c0_0 = arith.constant 0 : index
    %c0_1 = arith.constant 0 : index
    %0 = vector.load %arg1[%c0, %c0_0, %c0_1] : memref<2x8x128xbf16, #tpu.memory_space<vmem>>, vector<2x8x128xbf16>
    %1 = vector.shape_cast %0 : vector<2x8x128xbf16> to vector<16x128xbf16>
    %c0_2 = arith.constant 0 : index
    %c0_3 = arith.constant 0 : index
    %2 = vector.load %arg3[%c0_2, %c0_3] : memref<128x256xbf16, #tpu.memory_space<vmem>>, vector<128x256xbf16>
    %cst = arith.constant dense<0.000000e+00> : vector<16x256xf32>
    %3 = tpu.matmul %1, %2, %cst {dimension_numbers = #tpu.dot_dimension_numbers<[1], [0], [0], [1], [0, 0, 1, 1], [], []>} : vector<16x128xbf16>, vector<128x256xbf16>, vector<16x256xf32> -> vector<16x256xf32>
    %c0_4 = arith.constant 0 : index
    %c0_5 = arith.constant 0 : index
    %4 = vector.load %arg4[%c0_4, %c0_5] : memref<1x256xf32, #tpu.memory_space<vmem>>, vector<1x256xf32>
    %5 = vector.broadcast %4 : vector<1x256xf32> to vector<16x256xf32>
    %6 = arith.addf %3, %5 : vector<16x256xf32>
    %7 = vector.extract_strided_slice %6 {offsets = [0, 0], sizes = [16, 128], strides = [1, 1]} : vector<16x256xf32> to vector<16x128xf32>
    %8 = arith.truncf %7 : vector<16x128xf32> to vector<16x128xbf16>
    %9 = vector.extract_strided_slice %6 {offsets = [0, 128], sizes = [16, 128], strides = [1, 1]} : vector<16x256xf32> to vector<16x128xf32>
    %c0_6 = arith.constant 0 : index
    %c0_7 = arith.constant 0 : index
    %10 = vector.load %arg5[%c0_6, %c0_7] : memref<128x8xbf16, #tpu.memory_space<vmem>>, vector<128x8xbf16>
    %cst_8 = arith.constant dense<0.000000e+00> : vector<16x8xf32>
    %11 = tpu.matmul %8, %10, %cst_8 {dimension_numbers = #tpu.dot_dimension_numbers<[1], [0], [0], [1], [0, 0, 1, 1], [], []>} : vector<16x128xbf16>, vector<128x8xbf16>, vector<16x8xf32> -> vector<16x8xf32>
    %12 = vector.shape_cast %11 : vector<16x8xf32> to vector<2x8x8xf32>
    %c0_9 = arith.constant 0 : index
    %c0_10 = arith.constant 0 : index
    %c0_11 = arith.constant 0 : index
    %13 = vector.load %arg2[%c0_9, %c0_10, %c0_11] : memref<2x8x8xf32, #tpu.memory_space<vmem>>, vector<2x8x8xf32>
    %14 = arith.addf %12, %13 : vector<2x8x8xf32>
    %cst_12 = arith.constant dense<0xFF800000> : vector<2x8xf32>
    %15 = vector.multi_reduction <maximumf>, %14, %cst_12 [1] : vector<2x8x8xf32> to vector<2x8xf32>
    %16 = vector.shape_cast %15 : vector<2x8xf32> to vector<2x1x8xf32>
    %17 = vector.broadcast %16 : vector<2x1x8xf32> to vector<2x8x8xf32>
    %18 = arith.subf %14, %17 : vector<2x8x8xf32>
    %19 = math.exp %18 : vector<2x8x8xf32>
    %cst_13 = arith.constant dense<0.000000e+00> : vector<2x8xf32>
    %20 = vector.multi_reduction <add>, %19, %cst_13 [1] : vector<2x8x8xf32> to vector<2x8xf32>
    %21 = vector.shape_cast %20 : vector<2x8xf32> to vector<2x1x8xf32>
    %22 = tpu.reciprocal %21 {approx = true} : vector<2x1x8xf32> -> vector<2x1x8xf32>
    %23 = vector.broadcast %22 : vector<2x1x8xf32> to vector<2x8x8xf32>
    %24 = arith.mulf %19, %23 : vector<2x8x8xf32>
    %25 = vector.shape_cast %24 : vector<2x8x8xf32> to vector<16x8xf32>
    %26 = arith.truncf %25 : vector<16x8xf32> to vector<16x8xbf16>
    %c0_14 = arith.constant 0 : index
    %c0_15 = arith.constant 0 : index
    %27 = vector.load %arg6[%c0_14, %c0_15] : memref<8x128xbf16, #tpu.memory_space<vmem>>, vector<8x128xbf16>
    %cst_16 = arith.constant dense<0.000000e+00> : vector<16x128xf32>
    %28 = tpu.matmul %26, %27, %cst_16 {dimension_numbers = #tpu.dot_dimension_numbers<[1], [0], [0], [1], [0, 0, 1, 1], [], []>} : vector<16x8xbf16>, vector<8x128xbf16>, vector<16x128xf32> -> vector<16x128xf32>
    %29 = arith.mulf %28, %9 : vector<16x128xf32>
    %30 = vector.shape_cast %29 : vector<16x128xf32> to vector<2x8x128xf32>
    %cst_17 = arith.constant dense<0.000000e+00> : vector<2x128xf32>
    %31 = vector.multi_reduction <add>, %30, %cst_17 [1] : vector<2x8x128xf32> to vector<2x128xf32>
    %c0_18 = arith.constant 0 : index
    %c0_19 = arith.constant 0 : index
    %32 = vector.load %arg7[%c0_18, %c0_19] : memref<2x128xf32, #tpu.memory_space<vmem>>, vector<2x128xf32>
    tpu.vector_store %arg7[%c0_18, %c0_19], %31 {strides = array<i32>} : memref<2x128xf32, #tpu.memory_space<vmem>>, vector<2x128xf32>,
    return
  }
  func.func @transform_0(%arg0: i32) -> (i32, i32, i32) {
    %c0_i32 = arith.constant 0 : i32
    %c0_i32_0 = arith.constant 0 : i32
    %c0_i32_1 = arith.constant 0 : i32
    return %arg0, %c0_i32, %c0_i32_0 : i32, i32, i32
  }
  func.func @transform_1(%arg0: i32) -> (i32, i32, i32) {
    %c0_i32 = arith.constant 0 : i32
    %c0_i32_0 = arith.constant 0 : i32
    %c0_i32_1 = arith.constant 0 : i32
    return %arg0, %c0_i32, %c0_i32_0 : i32, i32, i32
  }
  func.func @transform_2(%arg0: i32) -> (i32, i32) {
    %c0_i32 = arith.constant 0 : i32
    %c0_i32_0 = arith.constant 0 : i32
    %c0_i32_1 = arith.constant 0 : i32
    return %c0_i32, %c0_i32_0 : i32, i32
  }
  func.func @transform_3(%arg0: i32) -> (i32, i32) {
    %c0_i32 = arith.constant 0 : i32
    %c0_i32_0 = arith.constant 0 : i32
    %c0_i32_1 = arith.constant 0 : i32
    return %c0_i32, %c0_i32_0 : i32, i32
  }
  func.func @transform_4(%arg0: i32) -> (i32, i32) {
    %c0_i32 = arith.constant 0 : i32
    %c0_i32_0 = arith.constant 0 : i32
    %c0_i32_1 = arith.constant 0 : i32
    return %c0_i32, %c0_i32_0 : i32, i32
  }
  func.func @transform_5(%arg0: i32) -> (i32, i32) {
    %c0_i32 = arith.constant 0 : i32
    %c0_i32_0 = arith.constant 0 : i32
    %c0_i32_1 = arith.constant 0 : i32
    return %c0_i32, %c0_i32_0 : i32, i32
  }
  func.func @transform_6(%arg0: i32) -> (i32, i32) {
    %c0_i32 = arith.constant 0 : i32
    %c0_i32_0 = arith.constant 0 : i32
    return %arg0, %c0_i32 : i32, i32
  }
}

module attributes {stable_mosaic.version = 11 : i64} {
  func.func @cross_attention_kernel(%arg0: i32, %arg1: memref<2x8x128xbf16, #tpu.memory_space<vmem>>, %arg2: memref<2x8x8xf32, #tpu.memory_space<vmem>>, %arg3: memref<128x256xbf16, #tpu.memory_space<vmem>>, %arg4: memref<1x256xf32, #tpu.memory_space<vmem>>, %arg5: memref<128x8xbf16, #tpu.memory_space<vmem>>, %arg6: memref<8x128xbf16, #tpu.memory_space<vmem>>, %arg7: memref<2x128xf32, #tpu.memory_space<vmem>>) attributes {dimension_semantics = [#tpu.dimension_semantics<parallel>], iteration_bounds = array<i64: 1>, scalar_prefetch = 0 : i64, scratch_operands = 0 : i64, tpu.core_type = #tpu.core_type<tc>, window_params = [{transform_indices = @transform_0, window_bounds = array<i64: 2, 8, 128>}, {transform_indices = @transform_1, window_bounds = array<i64: 2, 8, 8>}, {pipeline_mode = #tpu.pipeline_mode<synchronous>, transform_indices = @transform_2, window_bounds = array<i64: 128, 256>}, {pipeline_mode = #tpu.pipeline_mode<synchronous>, transform_indices = @transform_3, window_bounds = array<i64: 1, 256>}, {pipeline_mode = #tpu.pipeline_mode<synchronous>, transform_indices = @transform_4, window_bounds = array<i64: 128, 8>}, {pipeline_mode = #tpu.pipeline_mode<synchronous>, transform_indices = @transform_5, window_bounds = array<i64: 8, 128>}, {transform_indices = @transform_6, window_bounds = array<i64: 2, 128>}]} {
    %c0 = arith.constant 0 : index
    %c0_0 = arith.constant 0 : index
    %c0_1 = arith.constant 0 : index
    %0 = vector.load %arg1[%c0, %c0_0, %c0_1] : memref<2x8x128xbf16, #tpu.memory_space<vmem>>, vector<2x8x128xbf16>
    %1 = vector.shape_cast %0 : vector<2x8x128xbf16> to vector<16x128xbf16>
    %c0_2 = arith.constant 0 : index
    %c0_3 = arith.constant 0 : index
    %2 = vector.load %arg3[%c0_2, %c0_3] : memref<128x256xbf16, #tpu.memory_space<vmem>>, vector<128x256xbf16>
    %cst = arith.constant dense<0.000000e+00> : vector<16x256xf32>
    %3 = tpu.matmul %1, %2, %cst {dimension_numbers = #tpu.dot_dimension_numbers<[1], [0], [0], [1], [0, 0, 1, 1], [], []>} : vector<16x128xbf16>, vector<128x256xbf16>, vector<16x256xf32> -> vector<16x256xf32>
    %c0_4 = arith.constant 0 : index
    %c0_5 = arith.constant 0 : index
    %4 = vector.load %arg4[%c0_4, %c0_5] : memref<1x256xf32, #tpu.memory_space<vmem>>, vector<1x256xf32>
    %5 = vector.broadcast %4 : vector<1x256xf32> to vector<16x256xf32>
    %6 = arith.addf %3, %5 : vector<16x256xf32>
    %7 = vector.extract_strided_slice %6 {offsets = [0, 0], sizes = [16, 128], strides = [1, 1]} : vector<16x256xf32> to vector<16x128xf32>
    %8 = arith.truncf %7 : vector<16x128xf32> to vector<16x128xbf16>
    %9 = vector.extract_strided_slice %6 {offsets = [0, 128], sizes = [16, 128], strides = [1, 1]} : vector<16x256xf32> to vector<16x128xf32>
    %c0_6 = arith.constant 0 : index
    %c0_7 = arith.constant 0 : index
    %10 = vector.load %arg5[%c0_6, %c0_7] : memref<128x8xbf16, #tpu.memory_space<vmem>>, vector<128x8xbf16>
    %cst_8 = arith.constant dense<0.000000e+00> : vector<16x8xf32>
    %11 = tpu.matmul %8, %10, %cst_8 {dimension_numbers = #tpu.dot_dimension_numbers<[1], [0], [0], [1], [0, 0, 1, 1], [], []>} : vector<16x128xbf16>, vector<128x8xbf16>, vector<16x8xf32> -> vector<16x8xf32>
    %12 = vector.shape_cast %11 : vector<16x8xf32> to vector<2x8x8xf32>
    %c0_9 = arith.constant 0 : index
    %c0_10 = arith.constant 0 : index
    %c0_11 = arith.constant 0 : index
    %13 = vector.load %arg2[%c0_9, %c0_10, %c0_11] : memref<2x8x8xf32, #tpu.memory_space<vmem>>, vector<2x8x8xf32>
    %14 = arith.addf %12, %13 : vector<2x8x8xf32>
    %cst_12 = arith.constant dense<0xFF800000> : vector<2x8xf32>
    %15 = vector.multi_reduction <maximumf>, %14, %cst_12 [1] : vector<2x8x8xf32> to vector<2x8xf32>
    %16 = vector.shape_cast %15 : vector<2x8xf32> to vector<2x1x8xf32>
    %17 = vector.broadcast %16 : vector<2x1x8xf32> to vector<2x8x8xf32>
    %18 = arith.subf %14, %17 : vector<2x8x8xf32>
    %19 = math.exp %18 : vector<2x8x8xf32>
    %cst_13 = arith.constant dense<0.000000e+00> : vector<2x8xf32>
    %20 = vector.multi_reduction <add>, %19, %cst_13 [1] : vector<2x8x8xf32> to vector<2x8xf32>
    %21 = vector.shape_cast %20 : vector<2x8xf32> to vector<2x1x8xf32>
    %22 = tpu.reciprocal %21 {approx = true} : vector<2x1x8xf32> -> vector<2x1x8xf32>
    %23 = vector.broadcast %22 : vector<2x1x8xf32> to vector<2x8x8xf32>
    %24 = arith.mulf %19, %23 : vector<2x8x8xf32>
    %25 = vector.shape_cast %24 : vector<2x8x8xf32> to vector<16x8xf32>
    %26 = arith.truncf %25 : vector<16x8xf32> to vector<16x8xbf16>
    %c0_14 = arith.constant 0 : index
    %c0_15 = arith.constant 0 : index
    %27 = vector.load %arg6[%c0_14, %c0_15] : memref<8x128xbf16, #tpu.memory_space<vmem>>, vector<8x128xbf16>
    %cst_16 = arith.constant dense<0.000000e+00> : vector<16x128xf32>
    %28 = tpu.matmul %26, %27, %cst_16 {dimension_numbers = #tpu.dot_dimension_numbers<[1], [0], [0], [1], [0, 0, 1, 1], [], []>} : vector<16x8xbf16>, vector<8x128xbf16>, vector<16x128xf32> -> vector<16x128xf32>
    %29 = arith.mulf %28, %9 : vector<16x128xf32>
    %30 = vector.shape_cast %29 : vector<16x128xf32> to vector<2x8x128xf32>
    %cst_17 = arith.constant dense<0.000000e+00> : vector<2x128xf32>
    %31 = vector.multi_reduction <add>, %30, %cst_17 [1] : vector<2x8x128xf32> to vector<2x128xf32>
    %c0_18 = arith.constant 0 : index
    %c0_19 = arith.constant 0 : index
    %32 = vector.load %arg7[%c0_18, %c0_19] : memref<2x128xf32, #tpu.memory_space<vmem>>, vector<2x128xf32>
    tpu.vector_store %arg7[%c0_18, %c0_19], %31 {strides = array<i32>} : memref<2x128xf32, #tpu.memory_space<vmem>>, vector<2x128xf32>,
    return
  }
  func.func @transform_0(%arg0: i32) -> (i32, i32, i32) {
    %c0_i32 = arith.constant 0 : i32
    %c0_i32_0 = arith.constant 0 : i32
    %c0_i32_1 = arith.constant 0 : i32
    return %arg0, %c0_i32, %c0_i32_0 : i32, i32, i32
  }
  func.func @transform_1(%arg0: i32) -> (i32, i32, i32) {
    %c0_i32 = arith.constant 0 : i32
    %c0_i32_0 = arith.constant 0 : i32
    %c0_i32_1 = arith.constant 0 : i32
    return %arg0, %c0_i32, %c0_i32_0 : i32, i32, i32
  }
  func.func @transform_2(%arg0: i32) -> (i32, i32) {
    %c0_i32 = arith.constant 0 : i32
    %c0_i32_0 = arith.constant 0 : i32
    %c0_i32_1 = arith.constant 0 : i32
    return %c0_i32, %c0_i32_0 : i32, i32
  }
  func.func @transform_3(%arg0: i32) -> (i32, i32) {
    %c0_i32 = arith.constant 0 : i32
    %c0_i32_0 = arith.constant 0 : i32
    %c0_i32_1 = arith.constant 0 : i32
    return %c0_i32, %c0_i32_0 : i32, i32
  }
  func.func @transform_4(%arg0: i32) -> (i32, i32) {
    %c0_i32 = arith.constant 0 : i32
    %c0_i32_0 = arith.constant 0 : i32
    %c0_i32_1 = arith.constant 0 : i32
    return %c0_i32, %c0_i32_0 : i32, i32
  }
  func.func @transform_5(%arg0: i32) -> (i32, i32) {
    %c0_i32 = arith.constant 0 : i32
    %c0_i32_0 = arith.constant 0 : i32
    %c0_i32_1 = arith.constant 0 : i32
    return %c0_i32, %c0_i32_0 : i32, i32
  }
  func.func @transform_6(%arg0: i32) -> (i32, i32) {
    %c0_i32 = arith.constant 0 : i32
    %c0_i32_0 = arith.constant 0 : i32
    return %arg0, %c0_i32 : i32, i32
  }
}

</mosaic_0001>

<bundles_post_ra>
// kernel: tpu_custom_call.1
= control target key start
LH: loop header
LB: loop body
LE: loop exit
PB: predicated region body
PF: predicated region fallthrough
CT: control target
= control target key end

     0   :  { %11 = vsyncpa [#allocation3], 0  ;;  %s715_s0 = inlined_call_operand.vmem [shape: bf16[2,8,128], index: 0, kind: input, shape index: {}]   ;;  %s716_s1 = inlined_call_operand.vmem [shape: f32[2,8,8], index: 1, kind: input, shape index: {}]   ;;  %s717_s2 = inlined_call_operand.hbm [shape: bf16[128,256], index: 2, kind: input, shape index: {}]   ;;  %s718_s3 = inlined_call_operand.vmem [shape: f32[1,256], index: 3, kind: input, shape index: {}]   ;;  %s719_s4 = inlined_call_operand.vmem [shape: bf16[128,8], index: 4, kind: input, shape index: {}]   ;;  %s720_s5 = inlined_call_operand.vmem [shape: bf16[8,128], index: 5, kind: input, shape index: {}]   ;;  %s721_s6 = inlined_call_operand.hbm [shape: f32[2,128], index: 6, kind: output, shape index: {}]  }
   0x1   :  { %12 = vsyncpa [#allocation4], 0  ;;  %s591_s21 = smov [#allocation2]   ;;  %s543_s25 = scalar_lea.hbm %s717_s2, 2048 }
   0x2   :  { %s22_s22 = sshll.u32 %s591_s21, 4  ;;  %p544_p0 = scmp.ne.s32.totalorder %s717_s2, %s543_s25  ;;  %s23_s22 = int_to_ptr.vmem [resolvable:$true] %s22_s22 }
   0x3   :  { %p547_p1 = scmp.lt.u32.totalorder %s543_s25, %s717_s2 }
   0x5   :  { %p549_p2 = pnand %p547_p1, %p544_p0 }
   0x7   :  { %552 = shalt.err (!%p549_p2)
}
   0x8   :  { %s553_s30 = scalar_lea.vmem %s23_s22, 2048  ;;  %p558_p4 = scmp.lt.s32.totalorder %s23_s22, %s23_s22 }
   0x9   :  { %p554_p3 = scmp.ne.s32.totalorder %s23_s22, %s553_s30  ;;  %p559_p5 = scmp.lt.s32.totalorder %s553_s30, %s553_s30 }
   0xb   :  { %p560_p6 = por %p559_p5, %p558_p4 }
   0xd   :  { %p561_p7 = pnand %p560_p6, %p554_p3 }
   0xf   :  { %564 = shalt.err (!%p561_p7)
}
  0x10   :  { %s592_s7 = smov 128   ;;  %s593_s8 = smov 8  }
  0x11   :  { %28 = dma.hbm_to_vmem [thread:$0]  %s717_s2, 2048, %s23_s22, [#allocation3], %s592_s7, %s592_s7, %s593_s8  }
  0x12   :  { %587 = dma.done.wait [#allocation3], 2048  }
  0x13   :  { %588 = vsyncadd [#allocation3], 4294965248  ;;  %v594_v0 = vmov 0   ;;  %v595_v1 = vmov 0.0   ;;  %v502_v2 = vld [vmem:[#allocation2 + $0x4] ss:$8 sps:$4 sm:$0xff]   ;;  %v59_v27 = vlaneseq }
  0x14   :  { %187 = vmatprep.mubr.bf16.mxu0 %v594_v0  ;;  %469 = vmatprep.subr.bf16.mxu1 %v595_v1  ;;  %v504_v3 = vld [vmem:[#allocation2] ss:$8 sps:$4 sm:$0xff]   ;;  %v505_v4 = vld [vmem:[#allocation2 + $0x14] ss:$8 sps:$4 sm:$0xff]   ;;  %v507_v5 = vld [vmem:[#allocation2 + $0x10] ss:$8 sps:$4 sm:$0xff]  }
  0x15   :  { %155 = vmatprep.subr.bf16.mxu0 %v502_v2  ;;  %v508_v6 = vld [vmem:[#allocation2 + $0x24] ss:$8 sps:$4 sm:$0xff]   ;;  %v510_v7 = vld [vmem:[#allocation2 + $0x20] ss:$8 sps:$4 sm:$0xff]   ;;  %v511_v8 = vld [vmem:[#allocation2 + $0x34] ss:$8 sps:$4 sm:$0xff]  }
  0x16   :  { %156 = vmatpush1.bf16.msra.mxu0 %v504_v3  ;;  %v513_v9 = vld [vmem:[#allocation2 + $0x30] ss:$8 sps:$4 sm:$0xff]   ;;  %v514_v10 = vld [vmem:[#allocation2 + $0x44] ss:$8 sps:$4 sm:$0xff]   ;;  %v516_v13 = vld [vmem:[#allocation2 + $0x40] ss:$8 sps:$4 sm:$0xff]  }
  0x17   :  { %157 = vmatprep.subr.bf16.mxu0 %v505_v4  ;;  %v527_v11 = vld [vmem:[%s719_s4] sm:$0xff]   ;;  %v528_v12 = vld [vmem:[%s719_s4 + $0x8] sm:$0xff]   ;;  %v517_v14 = vld [vmem:[#allocation2 + $0x54] ss:$8 sps:$4 sm:$0xff]   ;;  %vm596_vm0 = vmmov 0   ;;  %v672_v28 = vshrl.u32 %v59_v27, 7 }
  0x18   :  { %470 = vmatpush3.bf16.msra.mxu1 %v527_v11  ;;  %v529_v15 = vld [vmem:[%s719_s4 + $0x10] sm:$0xff]   ;;  %v520_v17 = vld [vmem:[#allocation2 + $0x64] ss:$8 sps:$4 sm:$0xff]   ;;  %v530_v18 = vld [vmem:[%s719_s4 + $0x18] sm:$0xff]   ;;  %485 = vmatprep.mubr.msk.bf16.mxu1 %vm596_vm0, %v595_v1  ;;  %vm352_vm1 = vcmask 1043456   ;;  %vm308_vm2 = vcmask 64512  }
  0x19   :  { %471 = vmatprep.subr.bf16.mxu1 %v595_v1  ;;  %v519_v16 = vld [vmem:[#allocation2 + $0x50] ss:$8 sps:$4 sm:$0xff]   ;;  %v522_v19 = vld [vmem:[#allocation2 + $0x60] ss:$8 sps:$4 sm:$0xff]   ;;  %v523_v20 = vld [vmem:[#allocation2 + $0x74] ss:$8 sps:$4 sm:$0xff]  }
  0x1a   :  { %158 = vmatpush1.bf16.msra.mxu0 %v507_v5  ;;  %v531_v21 = vld [vmem:[%s719_s4 + $0x20] sm:$0xff]   ;;  %v525_v22 = vld [vmem:[#allocation2 + $0x70] ss:$8 sps:$4 sm:$0xff]   ;;  %v532_v24 = vld [vmem:[%s719_s4 + $0x28] sm:$0xff]   ;;  %v61_v29 = vsub.s32 0, %v672_v28  ;;  %vm413_vm3 = vcmask 1041409  }
  0x1b   :  { %159 = vmatprep.subr.bf16.mxu0 %v508_v6  ;;  %v526_v23 = vld [vmem:[%s715_s0] sm:$0xff]   ;;  %v533_v25 = vld [vmem:[%s719_s4 + $0x30] sm:$0xff]   ;;  %v534_v26 = vld [vmem:[%s719_s4 + $0x38] sm:$0xff]  }
  0x1c   :  { %472 = vmatpush3.bf16.msra.mxu1 %v528_v12  ;;  %v678_v30 = vld [vmem:[%s718_s3] sm:$0x3]  ;;  %v305_v43 = vld [vmem:[%s716_s1 + $0x8] sm:$0xff] }
  0x1d   :  { %473 = vmatprep.subr.bf16.mxu1 %v595_v1  ;;  %v62_v31 = vrot.slane %v678_v30, %v61_v29  ;;  %v348_v39 = vld [vmem:[%s720_s5] sm:$0xf] }
  0x1e   :  { %160 = vmatpush1.bf16.msra.mxu0 %v510_v7  ;;  %v354_v40 = vsel %vm352_vm1, %v348_v39, 0  ;;  %v304_v41 = vld [vmem:[%s716_s1] sm:$0xff]  ;;  %s597_s1 = smov [#allocation5]  }
  0x1f   :  { %161 = vmatprep.subr.bf16.mxu0 %v511_v8  ;;  %s423_s5 = sshll.u32 %s597_s1, 4  ;;  %s424_s5 = int_to_ptr.vmem [resolvable:$true] %s423_s5 }
  0x20   :  { %474 = vmatpush3.bf16.msra.mxu1 %v529_v15  ;;  %s565_s9 = scalar_lea.vmem %s424_s5, 32  ;;  %p570_p9 = scmp.lt.s32.totalorder %s424_s5, %s424_s5 }
  0x21   :  { %475 = vmatprep.subr.bf16.mxu1 %v595_v1  ;;  %p566_p8 = scmp.ne.s32.totalorder %s424_s5, %s565_s9  ;;  %p571_p10 = scmp.lt.s32.totalorder %s565_s9, %s565_s9 }
  0x22   :  { %162 = vmatpush1.bf16.msra.mxu0 %v513_v9 }
  0x23   :  { %163 = vmatprep.subr.bf16.mxu0 %v514_v10  ;;  %p572_p11 = por %p571_p10, %p570_p9 }
  0x24   :  { %476 = vmatpush3.bf16.msra.mxu1 %v530_v18 }
  0x25   :  { %477 = vmatprep.subr.bf16.mxu1 %v595_v1  ;;  %p573_p12 = pnand %p572_p11, %p566_p8 }
  0x26   :  { %164 = vmatpush1.bf16.msra.mxu0 %v516_v13 }
  0x27   :  { %165 = vmatprep.subr.bf16.mxu0 %v517_v14 }
  0x28   :  { %478 = vmatpush3.bf16.msra.mxu1 %v531_v21 }
  0x29   :  { %479 = vmatprep.subr.bf16.mxu1 %v595_v1 }
  0x2a   :  { %166 = vmatpush1.bf16.msra.mxu0 %v519_v16 }
  0x2b   :  { %167 = vmatprep.subr.bf16.mxu0 %v520_v17 }
  0x2c   :  { %480 = vmatpush3.bf16.msra.mxu1 %v532_v24  ;;  %v65_v24 = vsub.s32 1, %v672_v28 }
  0x2d   :  { %481 = vmatprep.subr.bf16.mxu1 %v595_v1 }
  0x2e   :  { %168 = vmatpush1.bf16.msra.mxu0 %v522_v19 }
  0x2f   :  { %169 = vmatprep.subr.bf16.mxu0 %v523_v20 }
  0x30   :  { %482 = vmatpush3.bf16.msra.mxu1 %v533_v25  ;;  %v66_v25 = vrot.slane %v678_v30, %v65_v24 }
  0x31   :  { %483 = vmatprep.subr.bf16.mxu1 %v595_v1 }
  0x32   :  { %170 = vmatpush1.bf16.msra.mxu0 %v525_v22 }
  0x33   :  { %489 = vmatprep.subr.bf16.mxu0 %v595_v1 }
  0x34   :  { %484 = vmatpush3.bf16.msra.mxu1 %v534_v26 }
  0x35   :  { %188 = vmatmul.mubr.bf16.vlgmr.msra.gmra.mrb[0].mxu0 %v526_v23 }
  0x36   :  { %491 = vmatprep.mubr.msk.bf16.mxu0 %vm596_vm0, %v595_v1  ;;  %490 = vmatpush3.bf16.msra.mxu0 %v354_v40 }
 0x108   :  { %v189_v32 = vpop.f32.mrb[0].mxu0 }
 0x109   :  { %v681_v33 = vpop.f32.mrb[1].mxu0  ;;  %v190_v35 = vadd.f32 %v189_v32, %v62_v31 }
 0x10a   :  { %v193_v34 = vpop.f32.mrb[2].mxu0  ;;  %v192_v26 = vadd.f32 %v681_v33, %v66_v25 }
 0x10b   :  { %v194_v36 = vadd.f32 %v193_v34, %v62_v31  ;;  %v683_v37 = vpop.f32.mrb[3].mxu0 }
 0x10c   :  { %v196_v29 = vadd.f32 %v683_v37, %v66_v25 }
 0x10d   :  { %v198_v38 = vpack.c.bf16 %v194_v36, %v190_v35 }
 0x10f   :  { %486 = vmatmul.mubr.bf16.vlgmr.msra.gmra.mrb[0].mxu1 %v198_v38 }
 0x1e2   :  { %v297_v42 = vpop.f32.mrb[0].mxu1 }
 0x1e3   :  { %v306_v44 = vadd.f32 %v304_v41, %v297_v42  ;;  %v487_v45 = vpop.f32.mrb[1].mxu1 }
 0x1e4   :  { %v300_v46 = vpop.f32.mrb[2].mxu1 }
 0x1e5   :  { %v309_v47 = vsel %vm308_vm2, %v306_v44, -inf  ;;  %v307_v48 = vadd.f32 %v305_v43, %v300_v46  ;;  %v488_v49 = vpop.f32.mrb[3].mxu1 }
 0x1e6   :  { %v310_v50 = vrot.slane %v309_v47, 4 }
 0x1e7   :  { %v316_v51 = vsel %vm308_vm2, %v307_v48, -inf }
 0x1e8   :  { %v311_v52 = vmax.f32 %v309_v47, %v310_v50  ;;  %v317_v53 = vrot.slane %v316_v51, 4 }
 0x1ea   :  { %v312_v54 = vrot.slane %v311_v52, 2  ;;  %v318_v55 = vmax.f32 %v316_v51, %v317_v53 }
 0x1ec   :  { %v313_v56 = vmax.f32 %v311_v52, %v312_v54  ;;  %v319_v57 = vrot.slane %v318_v55, 2 }
 0x1ee   :  { %v314_v58 = vrot.slane %v313_v56, 1  ;;  %v320_v59 = vmax.f32 %v318_v55, %v319_v57 }
 0x1f0   :  { %v315_v60 = vmax.f32 %v313_v56, %v314_v58  ;;  %v321_v61 = vrot.slane %v320_v59, 1 }
 0x1f2   :  { %v323_v62 = vsub.f32 %v306_v44, %v315_v60  ;;  %v322_v63 = vmax.f32 %v320_v59, %v321_v61 }
 0x1f4   :  { %v325_v0 = vmul.f32 1.442695, %v323_v62  ;;  %v324_v1 = vsub.f32 %v307_v48, %v322_v63 }
 0x1f6   :  { %535 = vpow2.f32 %v325_v0  ;;  %v327_v2 = vmul.f32 1.442695, %v324_v1 }
 0x1f8   :  { %537 = vpow2.f32 %v327_v2 }
 0x200   :  { %v536_v3 = vpop.eup %535 }
 0x201   :  { %v329_v4 = vsel %vm308_vm2, %v536_v3, 0.0 }
 0x202   :  { %v538_v5 = vpop.eup %537  ;;  %v330_v6 = vrot.slane %v329_v4, 4 }
 0x203   :  { %v336_v7 = vsel %vm308_vm2, %v538_v5, 0.0 }
 0x204   :  { %v331_v8 = vadd.f32 %v330_v6, %v329_v4  ;;  %v337_v9 = vrot.slane %v336_v7, 4 }
 0x206   :  { %v332_v10 = vrot.slane %v331_v8, 2  ;;  %v338_v11 = vadd.f32 %v337_v9, %v336_v7 }
 0x208   :  { %v333_v12 = vadd.f32 %v332_v10, %v331_v8  ;;  %v339_v13 = vrot.slane %v338_v11, 2 }
 0x20a   :  { %v334_v14 = vrot.slane %v333_v12, 1  ;;  %v340_v15 = vadd.f32 %v339_v13, %v338_v11 }
 0x20c   :  { %v335_v16 = vadd.f32 %v334_v14, %v333_v12  ;;  %v341_v17 = vrot.slane %v340_v15, 1 }
 0x20e   :  { %539 = vrcp.f32 %v335_v16  ;;  %v342_v18 = vadd.f32 %v341_v17, %v340_v15 }
 0x210   :  { %541 = vrcp.f32 %v342_v18 }
 0x218   :  { %v540_v19 = vpop.eup %539 }
 0x219   :  { %v345_v21 = vmul.f32 %v540_v19, %v536_v3 }
 0x21a   :  { %v542_v20 = vpop.eup %541 }
 0x21b   :  { %v346_v22 = vmul.f32 %v542_v20, %v538_v5 }
 0x21d   :  { %v347_v23 = vpack.c.bf16 %v346_v22, %v345_v21 }
 0x21f   :  { %492 = vmatmul.mubr.msk.bf16.vlgmr.msra.gmra.mrb[4].mxu0 %vm308_vm2, %v347_v23 }
 0x2f2   :  { %v390_v27 = vpop.f32.mrb[4].mxu0 }
 0x2f3   :  { %v397_v31 = vmul.f32 %v390_v27, %v192_v26  ;;  %v493_v32 = vpop.f32.mrb[5].mxu0 }
 0x2f4   :  { %v393_v34 = vpop.f32.mrb[6].mxu0 }
 0x2f5   :  { %v399_v35 = vrot.slane %v397_v31, 4  ;;  %v398_v36 = vmul.f32 %v393_v34, %v196_v29  ;;  %v494_v38 = vpop.f32.mrb[7].mxu0 }
 0x2f7   :  { %v400_v39 = vadd.f32 %v399_v35, %v397_v31  ;;  %v405_v40 = vrot.slane %v398_v36, 4 }
 0x2f9   :  { %v401_v41 = vrot.slane %v400_v39, 2  ;;  %v406_v42 = vadd.f32 %v405_v40, %v398_v36 }
 0x2fb   :  { %v402_v43 = vadd.f32 %v401_v41, %v400_v39  ;;  %v407_v44 = vrot.slane %v406_v42, 2 }
 0x2fd   :  { %v403_v28 = vrot.slane %v402_v43, 1  ;;  %v408_v45 = vadd.f32 %v407_v44, %v406_v42 }
 0x2ff   :  { %v409_v30 = vrot.slane %v408_v45, 1  ;;  %v404_v33 = vadd.f32 %v403_v28, %v402_v43 }
 0x301   :  { %v410_v37 = vadd.f32 %v409_v30, %v408_v45 }
 0x303   :  { %v414_v46 = vsel %vm413_vm3, %v410_v37, %v404_v33 }
 0x304   :  { %416 = vst [vmem:[#allocation5] sm:$0x3] %v414_v46 }
 0x305   :  { %576 = shalt.err (!%p573_p12)
}
 0x306   :  { %s577_s11 = scalar_lea.hbm %s721_s6, 32 }
 0x307   :  { %p578_p13 = scmp.ne.s32.totalorder %s721_s6, %s577_s11  ;;  %p581_p0 = scmp.lt.u32.totalorder %s577_s11, %s721_s6 }
 0x309   :  { %p583_p1 = pnand %p581_p0, %p578_p13 }
 0x30b   :  { %586 = shalt.err (!%p583_p1)
}
 0x30c   :  { %426 = dma.vmem_to_hbm [thread:$0]  %s424_s5, 32, %s721_s6, [#allocation4]  }
 0x30d   :  { %589 = dma.done.wait [#allocation4], 32  }
 0x30e   :  { %590 = vsyncadd [#allocation4], 4294967264 }
 0x30f   :  { %430 = vsyncpa [#allocation3], 1 }
 0x310   :  { %431 = vsyncpa [#allocation4], 1 }

// kernel: tpu_custom_call.1
= control target key start
LH: loop header
LB: loop body
LE: loop exit
PB: predicated region body
PF: predicated region fallthrough
CT: control target
= control target key end

     0   :  { %11 = vsyncpa [#allocation3], 0  ;;  %s715_s0 = inlined_call_operand.vmem [shape: bf16[2,8,128], index: 0, kind: input, shape index: {}]   ;;  %s716_s1 = inlined_call_operand.vmem [shape: f32[2,8,8], index: 1, kind: input, shape index: {}]   ;;  %s717_s2 = inlined_call_operand.hbm [shape: bf16[128,256], index: 2, kind: input, shape index: {}]   ;;  %s718_s3 = inlined_call_operand.vmem [shape: f32[1,256], index: 3, kind: input, shape index: {}]   ;;  %s719_s4 = inlined_call_operand.vmem [shape: bf16[128,8], index: 4, kind: input, shape index: {}]   ;;  %s720_s5 = inlined_call_operand.vmem [shape: bf16[8,128], index: 5, kind: input, shape index: {}]   ;;  %s721_s6 = inlined_call_operand.hbm [shape: f32[2,128], index: 6, kind: output, shape index: {}]  }
   0x1   :  { %12 = vsyncpa [#allocation4], 0  ;;  %s591_s21 = smov [#allocation2]   ;;  %s543_s25 = scalar_lea.hbm %s717_s2, 2048 }
   0x2   :  { %s22_s22 = sshll.u32 %s591_s21, 4  ;;  %p544_p0 = scmp.ne.s32.totalorder %s717_s2, %s543_s25  ;;  %s23_s22 = int_to_ptr.vmem [resolvable:$true] %s22_s22 }
   0x3   :  { %p547_p1 = scmp.lt.u32.totalorder %s543_s25, %s717_s2 }
   0x5   :  { %p549_p2 = pnand %p547_p1, %p544_p0 }
   0x7   :  { %552 = shalt.err (!%p549_p2)
}
   0x8   :  { %s553_s30 = scalar_lea.vmem %s23_s22, 2048  ;;  %p558_p4 = scmp.lt.s32.totalorder %s23_s22, %s23_s22 }
   0x9   :  { %p554_p3 = scmp.ne.s32.totalorder %s23_s22, %s553_s30  ;;  %p559_p5 = scmp.lt.s32.totalorder %s553_s30, %s553_s30 }
   0xb   :  { %p560_p6 = por %p559_p5, %p558_p4 }
   0xd   :  { %p561_p7 = pnand %p560_p6, %p554_p3 }
   0xf   :  { %564 = shalt.err (!%p561_p7)
}
  0x10   :  { %s592_s7 = smov 128   ;;  %s593_s8 = smov 8  }
  0x11   :  { %28 = dma.hbm_to_vmem [thread:$0]  %s717_s2, 2048, %s23_s22, [#allocation3], %s592_s7, %s592_s7, %s593_s8  }
  0x12   :  { %587 = dma.done.wait [#allocation3], 2048  }
  0x13   :  { %588 = vsyncadd [#allocation3], 4294965248  ;;  %v594_v0 = vmov 0   ;;  %v595_v1 = vmov 0.0   ;;  %v502_v2 = vld [vmem:[#allocation2 + $0x4] ss:$8 sps:$4 sm:$0xff]   ;;  %v59_v27 = vlaneseq }
  0x14   :  { %187 = vmatprep.mubr.bf16.mxu0 %v594_v0  ;;  %469 = vmatprep.subr.bf16.mxu1 %v595_v1  ;;  %v504_v3 = vld [vmem:[#allocation2] ss:$8 sps:$4 sm:$0xff]   ;;  %v505_v4 = vld [vmem:[#allocation2 + $0x14] ss:$8 sps:$4 sm:$0xff]   ;;  %v507_v5 = vld [vmem:[#allocation2 + $0x10] ss:$8 sps:$4 sm:$0xff]  }
  0x15   :  { %155 = vmatprep.subr.bf16.mxu0 %v502_v2  ;;  %v508_v6 = vld [vmem:[#allocation2 + $0x24] ss:$8 sps:$4 sm:$0xff]   ;;  %v510_v7 = vld [vmem:[#allocation2 + $0x20] ss:$8 sps:$4 sm:$0xff]   ;;  %v511_v8 = vld [vmem:[#allocation2 + $0x34] ss:$8 sps:$4 sm:$0xff]  }
  0x16   :  { %156 = vmatpush1.bf16.msra.mxu0 %v504_v3  ;;  %v513_v9 = vld [vmem:[#allocation2 + $0x30] ss:$8 sps:$4 sm:$0xff]   ;;  %v514_v10 = vld [vmem:[#allocation2 + $0x44] ss:$8 sps:$4 sm:$0xff]   ;;  %v516_v13 = vld [vmem:[#allocation2 + $0x40] ss:$8 sps:$4 sm:$0xff]  }
  0x17   :  { %157 = vmatprep.subr.bf16.mxu0 %v505_v4  ;;  %v527_v11 = vld [vmem:[%s719_s4] sm:$0xff]   ;;  %v528_v12 = vld [vmem:[%s719_s4 + $0x8] sm:$0xff]   ;;  %v517_v14 = vld [vmem:[#allocation2 + $0x54] ss:$8 sps:$4 sm:$0xff]   ;;  %vm596_vm0 = vmmov 0   ;;  %v672_v28 = vshrl.u32 %v59_v27, 7 }
  0x18   :  { %470 = vmatpush3.bf16.msra.mxu1 %v527_v11  ;;  %v529_v15 = vld [vmem:[%s719_s4 + $0x10] sm:$0xff]   ;;  %v520_v17 = vld [vmem:[#allocation2 + $0x64] ss:$8 sps:$4 sm:$0xff]   ;;  %v530_v18 = vld [vmem:[%s719_s4 + $0x18] sm:$0xff]   ;;  %485 = vmatprep.mubr.msk.bf16.mxu1 %vm596_vm0, %v595_v1  ;;  %vm352_vm1 = vcmask 1043456   ;;  %vm308_vm2 = vcmask 64512  }
  0x19   :  { %471 = vmatprep.subr.bf16.mxu1 %v595_v1  ;;  %v519_v16 = vld [vmem:[#allocation2 + $0x50] ss:$8 sps:$4 sm:$0xff]   ;;  %v522_v19 = vld [vmem:[#allocation2 + $0x60] ss:$8 sps:$4 sm:$0xff]   ;;  %v523_v20 = vld [vmem:[#allocation2 + $0x74] ss:$8 sps:$4 sm:$0xff]  }
  0x1a   :  { %158 = vmatpush1.bf16.msra.mxu0 %v507_v5  ;;  %v531_v21 = vld [vmem:[%s719_s4 + $0x20] sm:$0xff]   ;;  %v525_v22 = vld [vmem:[#allocation2 + $0x70] ss:$8 sps:$4 sm:$0xff]   ;;  %v532_v24 = vld [vmem:[%s719_s4 + $0x28] sm:$0xff]   ;;  %v61_v29 = vsub.s32 0, %v672_v28  ;;  %vm413_vm3 = vcmask 1041409  }
  0x1b   :  { %159 = vmatprep.subr.bf16.mxu0 %v508_v6  ;;  %v526_v23 = vld [vmem:[%s715_s0] sm:$0xff]   ;;  %v533_v25 = vld [vmem:[%s719_s4 + $0x30] sm:$0xff]   ;;  %v534_v26 = vld [vmem:[%s719_s4 + $0x38] sm:$0xff]  }
  0x1c   :  { %472 = vmatpush3.bf16.msra.mxu1 %v528_v12  ;;  %v678_v30 = vld [vmem:[%s718_s3] sm:$0x3]  ;;  %v305_v43 = vld [vmem:[%s716_s1 + $0x8] sm:$0xff] }
  0x1d   :  { %473 = vmatprep.subr.bf16.mxu1 %v595_v1  ;;  %v62_v31 = vrot.slane %v678_v30, %v61_v29  ;;  %v348_v39 = vld [vmem:[%s720_s5] sm:$0xf] }
  0x1e   :  { %160 = vmatpush1.bf16.msra.mxu0 %v510_v7  ;;  %v354_v40 = vsel %vm352_vm1, %v348_v39, 0  ;;  %v304_v41 = vld [vmem:[%s716_s1] sm:$0xff]  ;;  %s597_s1 = smov [#allocation5]  }
  0x1f   :  { %161 = vmatprep.subr.bf16.mxu0 %v511_v8  ;;  %s423_s5 = sshll.u32 %s597_s1, 4  ;;  %s424_s5 = int_to_ptr.vmem [resolvable:$true] %s423_s5 }
  0x20   :  { %474 = vmatpush3.bf16.msra.mxu1 %v529_v15  ;;  %s565_s9 = scalar_lea.vmem %s424_s5, 32  ;;  %p570_p9 = scmp.lt.s32.totalorder %s424_s5, %s424_s5 }
  0x21   :  { %475 = vmatprep.subr.bf16.mxu1 %v595_v1  ;;  %p566_p8 = scmp.ne.s32.totalorder %s424_s5, %s565_s9  ;;  %p571_p10 = scmp.lt.s32.totalorder %s565_s9, %s565_s9 }
  0x22   :  { %162 = vmatpush1.bf16.msra.mxu0 %v513_v9 }
  0x23   :  { %163 = vmatprep.subr.bf16.mxu0 %v514_v10  ;;  %p572_p11 = por %p571_p10, %p570_p9 }
  0x24   :  { %476 = vmatpush3.bf16.msra.mxu1 %v530_v18 }
  0x25   :  { %477 = vmatprep.subr.bf16.mxu1 %v595_v1  ;;  %p573_p12 = pnand %p572_p11, %p566_p8 }
  0x26   :  { %164 = vmatpush1.bf16.msra.mxu0 %v516_v13 }
  0x27   :  { %165 = vmatprep.subr.bf16.mxu0 %v517_v14 }
  0x28   :  { %478 = vmatpush3.bf16.msra.mxu1 %v531_v21 }
  0x29   :  { %479 = vmatprep.subr.bf16.mxu1 %v595_v1 }
  0x2a   :  { %166 = vmatpush1.bf16.msra.mxu0 %v519_v16 }
  0x2b   :  { %167 = vmatprep.subr.bf16.mxu0 %v520_v17 }
  0x2c   :  { %480 = vmatpush3.bf16.msra.mxu1 %v532_v24  ;;  %v65_v24 = vsub.s32 1, %v672_v28 }
  0x2d   :  { %481 = vmatprep.subr.bf16.mxu1 %v595_v1 }
  0x2e   :  { %168 = vmatpush1.bf16.msra.mxu0 %v522_v19 }
  0x2f   :  { %169 = vmatprep.subr.bf16.mxu0 %v523_v20 }
  0x30   :  { %482 = vmatpush3.bf16.msra.mxu1 %v533_v25  ;;  %v66_v25 = vrot.slane %v678_v30, %v65_v24 }
  0x31   :  { %483 = vmatprep.subr.bf16.mxu1 %v595_v1 }
  0x32   :  { %170 = vmatpush1.bf16.msra.mxu0 %v525_v22 }
  0x33   :  { %489 = vmatprep.subr.bf16.mxu0 %v595_v1 }
  0x34   :  { %484 = vmatpush3.bf16.msra.mxu1 %v534_v26 }
  0x35   :  { %188 = vmatmul.mubr.bf16.vlgmr.msra.gmra.mrb[0].mxu0 %v526_v23 }
  0x36   :  { %491 = vmatprep.mubr.msk.bf16.mxu0 %vm596_vm0, %v595_v1  ;;  %490 = vmatpush3.bf16.msra.mxu0 %v354_v40 }
 0x108   :  { %v189_v32 = vpop.f32.mrb[0].mxu0 }
 0x109   :  { %v681_v33 = vpop.f32.mrb[1].mxu0  ;;  %v190_v35 = vadd.f32 %v189_v32, %v62_v31 }
 0x10a   :  { %v193_v34 = vpop.f32.mrb[2].mxu0  ;;  %v192_v26 = vadd.f32 %v681_v33, %v66_v25 }
 0x10b   :  { %v194_v36 = vadd.f32 %v193_v34, %v62_v31  ;;  %v683_v37 = vpop.f32.mrb[3].mxu0 }
 0x10c   :  { %v196_v29 = vadd.f32 %v683_v37, %v66_v25 }
 0x10d   :  { %v198_v38 = vpack.c.bf16 %v194_v36, %v190_v35 }
 0x10f   :  { %486 = vmatmul.mubr.bf16.vlgmr.msra.gmra.mrb[0].mxu1 %v198_v38 }
 0x1e2   :  { %v297_v42 = vpop.f32.mrb[0].mxu1 }
 0x1e3   :  { %v306_v44 = vadd.f32 %v304_v41, %v297_v42  ;;  %v487_v45 = vpop.f32.mrb[1].mxu1 }
 0x1e4   :  { %v300_v46 = vpop.f32.mrb[2].mxu1 }
 0x1e5   :  { %v309_v47 = vsel %vm308_vm2, %v306_v44, -inf  ;;  %v307_v48 = vadd.f32 %v305_v43, %v300_v46  ;;  %v488_v49 = vpop.f32.mrb[3].mxu1 }
 0x1e6   :  { %v310_v50 = vrot.slane %v309_v47, 4 }
 0x1e7   :  { %v316_v51 = vsel %vm308_vm2, %v307_v48, -inf }
 0x1e8   :  { %v311_v52 = vmax.f32 %v309_v47, %v310_v50  ;;  %v317_v53 = vrot.slane %v316_v51, 4 }
 0x1ea   :  { %v312_v54 = vrot.slane %v311_v52, 2  ;;  %v318_v55 = vmax.f32 %v316_v51, %v317_v53 }
 0x1ec   :  { %v313_v56 = vmax.f32 %v311_v52, %v312_v54  ;;  %v319_v57 = vrot.slane %v318_v55, 2 }
 0x1ee   :  { %v314_v58 = vrot.slane %v313_v56, 1  ;;  %v320_v59 = vmax.f32 %v318_v55, %v319_v57 }
 0x1f0   :  { %v315_v60 = vmax.f32 %v313_v56, %v314_v58  ;;  %v321_v61 = vrot.slane %v320_v59, 1 }
 0x1f2   :  { %v323_v62 = vsub.f32 %v306_v44, %v315_v60  ;;  %v322_v63 = vmax.f32 %v320_v59, %v321_v61 }
 0x1f4   :  { %v325_v0 = vmul.f32 1.442695, %v323_v62  ;;  %v324_v1 = vsub.f32 %v307_v48, %v322_v63 }
 0x1f6   :  { %535 = vpow2.f32 %v325_v0  ;;  %v327_v2 = vmul.f32 1.442695, %v324_v1 }
 0x1f8   :  { %537 = vpow2.f32 %v327_v2 }
 0x200   :  { %v536_v3 = vpop.eup %535 }
 0x201   :  { %v329_v4 = vsel %vm308_vm2, %v536_v3, 0.0 }
 0x202   :  { %v538_v5 = vpop.eup %537  ;;  %v330_v6 = vrot.slane %v329_v4, 4 }
 0x203   :  { %v336_v7 = vsel %vm308_vm2, %v538_v5, 0.0 }
 0x204   :  { %v331_v8 = vadd.f32 %v330_v6, %v329_v4  ;;  %v337_v9 = vrot.slane %v336_v7, 4 }
 0x206   :  { %v332_v10 = vrot.slane %v331_v8, 2  ;;  %v338_v11 = vadd.f32 %v337_v9, %v336_v7 }
 0x208   :  { %v333_v12 = vadd.f32 %v332_v10, %v331_v8  ;;  %v339_v13 = vrot.slane %v338_v11, 2 }
 0x20a   :  { %v334_v14 = vrot.slane %v333_v12, 1  ;;  %v340_v15 = vadd.f32 %v339_v13, %v338_v11 }
 0x20c   :  { %v335_v16 = vadd.f32 %v334_v14, %v333_v12  ;;  %v341_v17 = vrot.slane %v340_v15, 1 }
 0x20e   :  { %539 = vrcp.f32 %v335_v16  ;;  %v342_v18 = vadd.f32 %v341_v17, %v340_v15 }
 0x210   :  { %541 = vrcp.f32 %v342_v18 }
 0x218   :  { %v540_v19 = vpop.eup %539 }
 0x219   :  { %v345_v21 = vmul.f32 %v540_v19, %v536_v3 }
 0x21a   :  { %v542_v20 = vpop.eup %541 }
 0x21b   :  { %v346_v22 = vmul.f32 %v542_v20, %v538_v5 }
 0x21d   :  { %v347_v23 = vpack.c.bf16 %v346_v22, %v345_v21 }
 0x21f   :  { %492 = vmatmul.mubr.msk.bf16.vlgmr.msra.gmra.mrb[4].mxu0 %vm308_vm2, %v347_v23 }
 0x2f2   :  { %v390_v27 = vpop.f32.mrb[4].mxu0 }
 0x2f3   :  { %v397_v31 = vmul.f32 %v390_v27, %v192_v26  ;;  %v493_v32 = vpop.f32.mrb[5].mxu0 }
 0x2f4   :  { %v393_v34 = vpop.f32.mrb[6].mxu0 }
 0x2f5   :  { %v399_v35 = vrot.slane %v397_v31, 4  ;;  %v398_v36 = vmul.f32 %v393_v34, %v196_v29  ;;  %v494_v38 = vpop.f32.mrb[7].mxu0 }
 0x2f7   :  { %v400_v39 = vadd.f32 %v399_v35, %v397_v31  ;;  %v405_v40 = vrot.slane %v398_v36, 4 }
 0x2f9   :  { %v401_v41 = vrot.slane %v400_v39, 2  ;;  %v406_v42 = vadd.f32 %v405_v40, %v398_v36 }
 0x2fb   :  { %v402_v43 = vadd.f32 %v401_v41, %v400_v39  ;;  %v407_v44 = vrot.slane %v406_v42, 2 }
 0x2fd   :  { %v403_v28 = vrot.slane %v402_v43, 1  ;;  %v408_v45 = vadd.f32 %v407_v44, %v406_v42 }
 0x2ff   :  { %v409_v30 = vrot.slane %v408_v45, 1  ;;  %v404_v33 = vadd.f32 %v403_v28, %v402_v43 }
 0x301   :  { %v410_v37 = vadd.f32 %v409_v30, %v408_v45 }
 0x303   :  { %v414_v46 = vsel %vm413_vm3, %v410_v37, %v404_v33 }
 0x304   :  { %416 = vst [vmem:[#allocation5] sm:$0x3] %v414_v46 }
 0x305   :  { %576 = shalt.err (!%p573_p12)
}
 0x306   :  { %s577_s11 = scalar_lea.hbm %s721_s6, 32 }
 0x307   :  { %p578_p13 = scmp.ne.s32.totalorder %s721_s6, %s577_s11  ;;  %p581_p0 = scmp.lt.u32.totalorder %s577_s11, %s721_s6 }
 0x309   :  { %p583_p1 = pnand %p581_p0, %p578_p13 }
 0x30b   :  { %586 = shalt.err (!%p583_p1)
}
 0x30c   :  { %426 = dma.vmem_to_hbm [thread:$0]  %s424_s5, 32, %s721_s6, [#allocation4]  }
 0x30d   :  { %589 = dma.done.wait [#allocation4], 32  }
 0x30e   :  { %590 = vsyncadd [#allocation4], 4294967264 }
 0x30f   :  { %430 = vsyncpa [#allocation3], 1 }
 0x310   :  { %431 = vsyncpa [#allocation4], 1 }

</bundles_post_ra>
